<compile_context>
chip_gen: v7x
topology: tpu7x:2x2x1
jax: 0.10.0
libtpu: 0.0.40
codegen_flags: <defaults>
</compile_context>

<pallas_src>
import functools
import math

import numpy as np
import jax
import jax.numpy as jnp
from jax import lax
from jax.experimental import pallas as pl
from jax.experimental.pallas import tpu as pltpu


def _debiased_loss_kernel(n_ref,        # (1, 1)  f32   N = B - B // num_classes
                          emb_row_ref,  # (TM, H)       anchor rows
                          emb_all_ref,  # (B, H)        all embeddings (resident)
                          cls_row_ref,  # (TM, 1) int32 anchor classes
                          cls_all_ref,  # (1, B)  int32 all classes
                          idx_row_ref,  # (TM, 1) int32 global anchor row index
                          out_ref,      # (TM, 1) f32   per-anchor sum of loss terms
                          *, tau, inv_temp, exp_floor):
    tm = emb_row_ref.shape[0]
    b = emb_all_ref.shape[0]

    # exp(<e_a, e_k> / temperature): one MXU matmul per row slab, f32
    # accumulation, 1/temperature folded in as a constant multiply.
    d = lax.dot_general(
        emb_row_ref[...], emb_all_ref[...],
        dimension_numbers=(((1,), (1,)), ((), ())),
        preferred_element_type=jnp.float32,
    ) * jnp.float32(inv_temp)
    p = jnp.exp(d)                                                    # (TM, B) f32

    same = cls_row_ref[...] == cls_all_ref[...]                       # (TM, B)
    col_g = lax.broadcasted_iota(jnp.int32, (tm, b), 1)
    pos_mask = jnp.logical_and(same, idx_row_ref[...] != col_g)       # off-diag positives

    # Per-anchor sum of exp(d) over negatives (different class).  The diagonal
    # is same-class, so it can never contribute here: no diag handling needed.
    neg_sum = jnp.sum(jnp.where(same, 0.0, p), axis=1, keepdims=True)  # (TM, 1)

    n = n_ref[...]                                                     # (1, 1) broadcasts
    ng = jnp.maximum(
        (neg_sum - (jnp.float32(tau) * n) * p) * jnp.float32(1.0 / (1.0 - tau)),
        n * jnp.float32(exp_floor))                                    # (TM, B)

    # log(pos + Ng) - log(pos) == log(1 + Ng / pos): single log, and since
    # pos > 0 and Ng >= N * exp(-1/T) > 0 the argument is always > 1.
    term = jnp.where(pos_mask, jnp.log(1.0 + ng / p), 0.0)
    out_ref[...] = jnp.sum(term, axis=1, keepdims=True)               # (TM, 1)


def debiased_contrastive_loss(embeddings, classes, *, tau=0.05, temperature=0.05):
    """Pallas TPU implementation of DebiasedContrastiveLoss.forward."""
    B, H = embeddings.shape
    cls = jnp.asarray(classes).reshape(-1).astype(jnp.int32)

    # Scalar statistics computed outside the kernel (O(B log B), no (B,B) work):
    # num_classes, number of positive pairs, and N = B - B // num_classes.
    s = jnp.sort(cls)
    num_classes = 1 + jnp.sum((s[1:] != s[:-1]).astype(jnp.int32))
    counts = (jnp.searchsorted(s, cls, side='right')
              - jnp.searchsorted(s, cls, side='left')).astype(jnp.int32)
    n_pairs = jnp.sum(counts) - B          # NaN loss if 0 (matches the reference)
    N = (jnp.int32(B) - jnp.int32(B) // num_classes).astype(jnp.float32).reshape(1, 1)

    # Row-slab size: 128-aligned where possible (lane/MXU friendly, keeps the
    # per-slab (TM, B) intermediates small); otherwise the full batch (block
    # shape == full array dims satisfies the (8, 128) rule for small B).
    TM = 128 if (B % 128 == 0) else B
    GM = B // TM

    cls_col = cls.reshape(B, 1)
    cls_row = cls.reshape(1, B)
    row_idx = jnp.arange(B, dtype=jnp.int32).reshape(B, 1)

    kernel = functools.partial(
        _debiased_loss_kernel,
        tau=float(tau),
        inv_temp=1.0 / float(temperature),
        exp_floor=math.exp(-1.0 / float(temperature)))

    per_anchor = pl.pallas_call(
        kernel,
        out_shape=jax.ShapeDtypeStruct((B, 1), jnp.float32),
        grid=(GM,),
        in_specs=[
            pl.BlockSpec((1, 1), lambda i: (0, 0)),     # N (scalar, broadcast)
            pl.BlockSpec((TM, H), lambda i: (i, 0)),    # anchor rows
            pl.BlockSpec((B, H), lambda i: (0, 0)),     # full embeddings (resident)
            pl.BlockSpec((TM, 1), lambda i: (i, 0)),    # anchor classes
            pl.BlockSpec((1, B), lambda i: (0, 0)),     # all classes
            pl.BlockSpec((TM, 1), lambda i: (i, 0)),    # global anchor row index
        ],
        out_specs=pl.BlockSpec((TM, 1), lambda i: (i, 0)),
        compiler_params=pltpu.CompilerParams(
            dimension_semantics=("parallel",)),
    )(N, embeddings, embeddings, cls_col, cls_row, row_idx)

    return jnp.sum(per_anchor) / n_pairs.astype(jnp.float32)


def _numpy_reference(emb, cls, tau, temperature):
    """Direct numpy port of the PyTorch forward (with explicit gathers)."""
    emb = np.asarray(emb, dtype=np.float64)
    cls = np.asarray(cls)
    B = emb.shape[0]
    num_classes = np.unique(cls).size
    d = emb @ emb.T / temperature
    pos_mask = cls[:, None] == cls[None, :]
    np.fill_diagonal(pos_mask, False)
    ix_a, ix_p = np.nonzero(pos_mask)
    neg_mask = cls[ix_a][:, None] != cls[None, :]
    _, ix_neg = np.nonzero(neg_mask)
    ix_neg = ix_neg.reshape(ix_a.shape[0], -1)
    pos = np.exp(d[ix_a, ix_p])
    neg = np.exp(d[ix_a[:, None], ix_neg]).sum(axis=1)
    N = B - B // num_classes
    Ng = np.maximum((neg - N * pos * tau) / (1.0 - tau),
                    N * np.exp(-1.0 / temperature))
    return float((np.log(pos + Ng) - np.log(pos)).mean())


if __name__ == "__main__":
    B, H = 8, 32  # small batch of 8 embeddings, hidden dim 32
    tau, temperature = 0.05, 0.05

    key = jax.random.PRNGKey(0)
    emb = jax.random.normal(key, (B, H), dtype=jnp.float32)
    # l2-normalize (the loss assumes dot products roughly in [-1, 1])
    emb = emb / jnp.linalg.norm(emb, axis=1, keepdims=True)
    # bf16 inputs: the kernel runs the MXU in bf16 with f32 accumulation.
    emb_bf16 = emb.astype(jnp.bfloat16)
    # 4 classes, 2 samples each (balanced, as the reference gather requires)
    classes = jnp.array([0, 1, 2, 3, 0, 1, 2, 3], dtype=jnp.int32)

    loss = debiased_contrastive_loss(emb_bf16, classes,
                                     tau=tau, temperature=temperature)
    loss = jax.block_until_ready(loss)

    # Reference sees the same bf16-rounded values, so only accumulation /
    # transcendental precision differs (f32 vs f64).
    emb_ref = np.asarray(emb_bf16.astype(jnp.float32))
    ref = _numpy_reference(emb_ref, np.asarray(classes), tau, temperature)
    np.testing.assert_allclose(float(loss), ref, rtol=2e-4, atol=1e-5)

    print("KERNEL_OK")
</pallas_src>

<mosaic_0001>
module attributes {stable_mosaic.version = 11 : i64} {
  func.func @_debiased_loss_kernel(%arg0: i32, %arg1: memref<1x1xf32, #tpu.memory_space<vmem>>, %arg2: memref<8x32xbf16, #tpu.memory_space<vmem>>, %arg3: memref<8x32xbf16, #tpu.memory_space<vmem>>, %arg4: memref<8x1xi32, #tpu.memory_space<vmem>>, %arg5: memref<1x8xi32, #tpu.memory_space<vmem>>, %arg6: memref<8x1xi32, #tpu.memory_space<vmem>>, %arg7: memref<8x1xf32, #tpu.memory_space<vmem>>) attributes {dimension_semantics = [#tpu.dimension_semantics<parallel>], iteration_bounds = array<i64: 1>, scalar_prefetch = 0 : i64, scratch_operands = 0 : i64, tpu.core_type = #tpu.core_type<tc>, window_params = [{pipeline_mode = #tpu.pipeline_mode<synchronous>, transform_indices = @transform_0, window_bounds = array<i64: 1, 1>}, {transform_indices = @transform_1, window_bounds = array<i64: 8, 32>}, {pipeline_mode = #tpu.pipeline_mode<synchronous>, transform_indices = @transform_2, window_bounds = array<i64: 8, 32>}, {transform_indices = @transform_3, window_bounds = array<i64: 8, 1>}, {pipeline_mode = #tpu.pipeline_mode<synchronous>, transform_indices = @transform_4, window_bounds = array<i64: 1, 8>}, {transform_indices = @transform_5, window_bounds = array<i64: 8, 1>}, {transform_indices = @transform_6, window_bounds = array<i64: 8, 1>}]} {
    %c0 = arith.constant 0 : index
    %c0_0 = arith.constant 0 : index
    %0 = vector.load %arg2[%c0, %c0_0] : memref<8x32xbf16, #tpu.memory_space<vmem>>, vector<8x32xbf16>
    %c0_1 = arith.constant 0 : index
    %c0_2 = arith.constant 0 : index
    %1 = vector.load %arg3[%c0_1, %c0_2] : memref<8x32xbf16, #tpu.memory_space<vmem>>, vector<8x32xbf16>
    %cst = arith.constant dense<0.000000e+00> : vector<8x8xf32>
    %2 = tpu.matmul %0, %1, %cst {dimension_numbers = #tpu.dot_dimension_numbers<[1], [1], [0], [0], [0, 0, 1, 0], [], []>} : vector<8x32xbf16>, vector<8x32xbf16>, vector<8x8xf32> -> vector<8x8xf32>
    %cst_3 = arith.constant 2.000000e+01 : f32
    %3 = vector.broadcast %cst_3 : f32 to vector<8x8xf32>
    %4 = arith.mulf %2, %3 : vector<8x8xf32>
    %5 = math.exp %4 : vector<8x8xf32>
    %c0_4 = arith.constant 0 : index
    %c0_5 = arith.constant 0 : index
    %6 = vector.load %arg4[%c0_4, %c0_5] : memref<8x1xi32, #tpu.memory_space<vmem>>, vector<8x1xi32>
    %c0_6 = arith.constant 0 : index
    %c0_7 = arith.constant 0 : index
    %7 = vector.load %arg5[%c0_6, %c0_7] : memref<1x8xi32, #tpu.memory_space<vmem>>, vector<1x8xi32>
    %8 = vector.broadcast %6 : vector<8x1xi32> to vector<8x8xi32>
    %9 = vector.broadcast %7 : vector<1x8xi32> to vector<8x8xi32>
    %10 = arith.cmpi eq, %8, %9 : vector<8x8xi32>
    %11 = tpu.iota {dimensions = array<i32: 1>} : vector<8x8xi32>
    %c0_8 = arith.constant 0 : index
    %c0_9 = arith.constant 0 : index
    %12 = vector.load %arg6[%c0_8, %c0_9] : memref<8x1xi32, #tpu.memory_space<vmem>>, vector<8x1xi32>
    %13 = vector.broadcast %12 : vector<8x1xi32> to vector<8x8xi32>
    %14 = arith.cmpi ne, %13, %11 : vector<8x8xi32>
    %15 = arith.andi %10, %14 : vector<8x8xi1>
    %cst_10 = arith.constant 0.000000e+00 : f32
    %16 = vector.broadcast %cst_10 : f32 to vector<8x8xf32>
    %17 = arith.select %10, %16, %5 : vector<8x8xi1>, vector<8x8xf32>
    %cst_11 = arith.constant dense<0.000000e+00> : vector<8xf32>
    %18 = vector.multi_reduction <add>, %17, %cst_11 [1] : vector<8x8xf32> to vector<8xf32>
    %19 = vector.shape_cast %18 : vector<8xf32> to vector<8x1xf32>
    %c0_12 = arith.constant 0 : index
    %c0_13 = arith.constant 0 : index
    %20 = vector.load %arg1[%c0_12, %c0_13] : memref<1x1xf32, #tpu.memory_space<vmem>>, vector<1x1xf32>
    %cst_14 = arith.constant 5.000000e-02 : f32
    %21 = vector.broadcast %cst_14 : f32 to vector<1x1xf32>
    %22 = arith.mulf %21, %20 : vector<1x1xf32>
    %23 = vector.broadcast %22 : vector<1x1xf32> to vector<8x8xf32>
    %24 = arith.mulf %23, %5 : vector<8x8xf32>
    %25 = vector.broadcast %19 : vector<8x1xf32> to vector<8x8xf32>
    %26 = arith.subf %25, %24 : vector<8x8xf32>
    %cst_15 = arith.constant 1.05263162 : f32
    %27 = vector.broadcast %cst_15 : f32 to vector<8x8xf32>
    %28 = arith.mulf %26, %27 : vector<8x8xf32>
    %cst_16 = arith.constant 2.06115369E-9 : f32
    %29 = vector.broadcast %cst_16 : f32 to vector<1x1xf32>
    %30 = arith.mulf %20, %29 : vector<1x1xf32>
    %31 = vector.broadcast %30 : vector<1x1xf32> to vector<8x8xf32>
    %32 = arith.maximumf %28, %31 : vector<8x8xf32>
    %33 = arith.divf %32, %5 : vector<8x8xf32>
    %cst_17 = arith.constant 1.000000e+00 : f32
    %34 = vector.broadcast %cst_17 : f32 to vector<8x8xf32>
    %35 = arith.addf %34, %33 : vector<8x8xf32>
    %36 = math.log %35 : vector<8x8xf32>
    %cst_18 = arith.constant 0.000000e+00 : f32
    %37 = vector.broadcast %cst_18 : f32 to vector<8x8xf32>
    %38 = arith.select %15, %36, %37 : vector<8x8xi1>, vector<8x8xf32>
    %cst_19 = arith.constant dense<0.000000e+00> : vector<8xf32>
    %39 = vector.multi_reduction <add>, %38, %cst_19 [1] : vector<8x8xf32> to vector<8xf32>
    %40 = vector.shape_cast %39 : vector<8xf32> to vector<8x1xf32>
    %c0_20 = arith.constant 0 : index
    %c0_21 = arith.constant 0 : index
    %41 = vector.load %arg7[%c0_20, %c0_21] : memref<8x1xf32, #tpu.memory_space<vmem>>, vector<8x1xf32>
    tpu.vector_store %arg7[%c0_20, %c0_21], %40 {strides = array<i32>} : memref<8x1xf32, #tpu.memory_space<vmem>>, vector<8x1xf32>,
    return
  }
  func.func @transform_0(%arg0: i32) -> (i32, i32) {
    %c0_i32 = arith.constant 0 : i32
    %c0_i32_0 = arith.constant 0 : i32
    %c0_i32_1 = arith.constant 0 : i32
    return %c0_i32, %c0_i32_0 : i32, i32
  }
  func.func @transform_1(%arg0: i32) -> (i32, i32) {
    %c0_i32 = arith.constant 0 : i32
    %c0_i32_0 = arith.constant 0 : i32
    return %arg0, %c0_i32 : i32, i32
  }
  func.func @transform_2(%arg0: i32) -> (i32, i32) {
    %c0_i32 = arith.constant 0 : i32
    %c0_i32_0 = arith.constant 0 : i32
    %c0_i32_1 = arith.constant 0 : i32
    return %c0_i32, %c0_i32_0 : i32, i32
  }
  func.func @transform_3(%arg0: i32) -> (i32, i32) {
    %c0_i32 = arith.constant 0 : i32
    %c0_i32_0 = arith.constant 0 : i32
    return %arg0, %c0_i32 : i32, i32
  }
  func.func @transform_4(%arg0: i32) -> (i32, i32) {
    %c0_i32 = arith.constant 0 : i32
    %c0_i32_0 = arith.constant 0 : i32
    %c0_i32_1 = arith.constant 0 : i32
    return %c0_i32, %c0_i32_0 : i32, i32
  }
  func.func @transform_5(%arg0: i32) -> (i32, i32) {
    %c0_i32 = arith.constant 0 : i32
    %c0_i32_0 = arith.constant 0 : i32
    return %arg0, %c0_i32 : i32, i32
  }
  func.func @transform_6(%arg0: i32) -> (i32, i32) {
    %c0_i32 = arith.constant 0 : i32
    %c0_i32_0 = arith.constant 0 : i32
    return %arg0, %c0_i32 : i32, i32
  }
}

</mosaic_0001>

<bundles_post_ra>
// kernel: tpu_custom_call.1
= control target key start
LH: loop header
LB: loop body
LE: loop exit
PB: predicated region body
PF: predicated region fallthrough
CT: control target
= control target key end

     0   :  { %vm28_vm0 = vcmask 261120   ;;  %v162_v0 = vmov 0.0   ;;  %vm163_vm1 = vmmov 0   ;;  %v88_v3 = vlaneseq  ;;  %s227_s2 = inlined_call_operand.vmem [shape: bf16[8,32], index: 2, kind: input, shape index: {}]   ;;  %s228_s0 = inlined_call_operand.<no memory space> [shape: f32[1,1], index: 0, kind: input, shape index: {}]   ;;  %s229_s3 = inlined_call_operand.vmem [shape: s32[8,1], index: 3, kind: input, shape index: {}]   ;;  %s230_s1 = inlined_call_operand.vmem [shape: bf16[8,32], index: 1, kind: input, shape index: {}]   ;;  %s231_s5 = inlined_call_operand.vmem [shape: s32[8,1], index: 5, kind: input, shape index: {}]   ;;  %s232_s4 = inlined_call_operand.vmem [shape: s32[1,8], index: 4, kind: input, shape index: {}]   ;;  %s233_s6 = inlined_call_operand.vmem [shape: f32[8,1], index: 6, kind: output, shape index: {}]  }
   0x1   :  { %145 = vmatprep.subr.bf16.mxu0 %v162_v0  ;;  %v27_v1 = vld [vmem:[%s227_s2] sm:$0xf]  ;;  %147 = vmatprep.mubr.msk.bf16.mxu0 %vm163_vm1, %v162_v0  ;;  %v11_v2 = vstv %s228_s0  ;;  %v164_v6 = vmov 0   ;;  %vm97_vm3 = vcmask 64512   ;;  %vm135_vm6 = vcmask 7168  }
   0x2   :  { %v78_v4 = vld [vmem:[%s229_s3] sm:$0xff]  ;;  %v33_v5 = vsel %vm28_vm0, %v27_v1, 0  ;;  %155 = vset.pattern.permute.xlu1 %v164_v6  ;;  %12 = vst [vmem:[#allocation2] sm:$0x1] %v11_v2  ;;  %154 = vset.pattern.permute.xlu0 %v164_v6  ;;  %v105_v7 = vshrl.u32 %v88_v3, 7  ;;  %v89_v37 = vand.u32 127, %v88_v3 }
   0x3   :  { %146 = vmatpush3.bf16.xpose.msra.mxu0 %v33_v5  ;;  %81 = vperm.xlu0 %154, %v78_v4   ;;  %v26_v8 = vld [vmem:[%s230_s1] sm:$0xf] }
   0x4   :  { %v106_v9 = vsub.s32 0, %v105_v7  ;;  %v90_v15 = vld [vmem:[%s231_s5] sm:$0xff] }
   0x5   :  { %v142_v22 = vld [vmem:[%s232_s4] ss:$0 sm:$0xff] }
   0x9   :  { %v101_v10 = vld [vmem:[#allocation2] sm:$0x1] }
   0xa   :  { %148 = vmatmul.mubr.msk.bf16.vlgmr.msra.gmra.mrb[0].mxu0 %vm28_vm0, %v26_v8  ;;  %v102_v11 = vmul.f32 0.05, %v101_v10  ;;  %v115_v12 = vmul.f32 2.0611537e-09, %v101_v10 }
   0xc   :  { %v107_v13 = vrot.slane %v102_v11, %v106_v9  ;;  %v120_v14 = vrot.slane %v115_v12, %v106_v9 }
   0xe   :  { %109 = vperm.xlu1 %155, %v107_v13  }
  0x12   :  { %122 = vperm.xlu1 %155, %v120_v14  }
  0x16   :  { %92 = vperm.xlu1 %155, %v90_v15  }
  0x82   :  { %v82_v23 = vpop.permute.xlu0 %81 }
  0x83   :  { %vm87_vm2 = vcmp.eq.s32.totalorder %v82_v23, %v142_v22 }
  0x8d   :  { %v110_v27 = vpop.permute.xlu1 %109 }
  0x91   :  { %v123_v32 = vpop.permute.xlu1 %122 }
  0x95   :  { %v93_v38 = vpop.permute.xlu1 %92 }
  0x96   :  { %vm94_vm4 = vcmp.ne.s32.totalorder %v93_v38, %v89_v37 }
  0x97   :  { %vm95_vm5 = vmand %vm87_vm2, %vm94_vm4 }
  0xdd   :  { %v69_v16 = vpop.f32.mrb[0].mxu0 }
  0xde   :  { %v75_v17 = vmul.f32 20.0, %v69_v16  ;;  %v149_v18 = vpop.f32.mrb[1].mxu0 }
  0xdf   :  { %v72_v19 = vpop.f32.mrb[2].mxu0 }
  0xe0   :  { %v76_v20 = vmul.f32 1.442695, %v75_v17  ;;  %v150_v21 = vpop.f32.mrb[3].mxu0 }
  0xe2   :  { %156 = vpow2.f32 %v76_v20 }
  0xec   :  { %v157_v24 = vpop.eup %156 }
  0xed   :  { %v96_v25 = vsel %vm87_vm2, 0.0, %v157_v24  ;;  %158 = vrcp.f32 %v157_v24  ;;  %v112_v28 = vmul.f32 %v157_v24, %v110_v27 }
  0xee   :  { %v98_v26 = vsel %vm97_vm3, %v96_v25, 0.0 }
  0xef   :  { %99 = vadd.xlane.f32.xlu0 %v98_v26 }
  0xf7   :  { %v159_v34 = vpop.eup %158 }
 0x17c   :  { %v100_v29 = vpop.xlane.xlu0 %99 }
 0x17d   :  { %v113_v30 = vsub.f32 %v100_v29, %v112_v28 }
 0x17f   :  { %v114_v31 = vmul.f32 1.0526316, %v113_v30 }
 0x181   :  { %v125_v33 = vmax.f32 %v114_v31, %v123_v32 }
 0x183   :  { %v127_v35 = vmul.f32 %v159_v34, %v125_v33 }
 0x185   :  { %v128_v36 = vadd.f32 1.0, %v127_v35 }
 0x187   :  { %160 = vlog2.f32 %v128_v36 }
 0x191   :  { %v161_v39 = vpop.eup %160 }
 0x192   :  { %v130_v40 = vmul.f32 0.6931472, %v161_v39 }
 0x194   :  { %v131_v41 = vsel %vm95_vm5, %v130_v40, 0.0 }
 0x195   :  { %v132_v42 = vsel %vm97_vm3, %v131_v41, 0.0 }
 0x196   :  { %133 = vadd.xlane.f32.xlu1 %v132_v42 }
 0x223   :  { %v134_v43 = vpop.xlane.xlu1 %133 }
 0x224   :  { %136 = vst.msk [vmem:[%s233_s6] sm:$0xff] %vm135_vm6, %v134_v43 }

</bundles_post_ra>
